<compile_context>
chip_gen: v7x
topology: tpu7x:2x2x1
jax: 0.10.0
libtpu: 0.0.40
codegen_flags: <defaults>
</compile_context>

<pallas_src>
import math

import jax
import jax.numpy as jnp
from jax.experimental import pallas as pl
from jax.experimental.pallas import tpu as pltpu


# ------------------------------ tiling helpers ------------------------------ #

def _aligned_tile(dim, target, align):
    """Largest multiple of `align` that divides `dim` and is <= target.
    Falls back to the full dim (always legal: block == full array dim)."""
    if dim <= target:
        return dim
    t = (target // align) * align
    while t >= align:
        if dim % t == 0:
            return t
        t -= align
    return dim


def _any_tile(dim, target):
    """Largest divisor of dim <= target (for non-lane axes)."""
    if dim <= target:
        return dim
    for t in range(target, 0, -1):
        if dim % t == 0:
            return t
    return dim


_VMEM_LIMIT = 32 * 1024 * 1024  # modest, safe on v5e/v6e/v7x; tiles are small


# ------------------------------ Pallas kernels ------------------------------ #

def pallas_linear(x, w, b, activation=None, out_dtype=jnp.bfloat16):
    """y = x @ w + b (optionally GELU). x:[M,K], w:[K,N], b:[N].
    Tiled (M,N,K) grid, bf16 MXU inputs, f32 VMEM accumulator."""
    M, K = x.shape
    Kw, N = w.shape
    assert K == Kw

    tm = _aligned_tile(M, 256, 8)
    tn = _aligned_tile(N, 256, 128)
    tk = _aligned_tile(K, 512, 128)
    gm, gn, gk = M // tm, N // tn, K // tk

    b2 = b.reshape(1, N).astype(jnp.float32)

    def kernel(x_ref, w_ref, b_ref, o_ref, acc_ref):
        @pl.when(pl.program_id(2) == 0)
        def _init():
            acc_ref[...] = jnp.zeros_like(acc_ref)

        acc_ref[...] += jnp.dot(x_ref[...], w_ref[...],
                                preferred_element_type=jnp.float32)

        @pl.when(pl.program_id(2) == pl.num_programs(2) - 1)
        def _finalize():
            y = acc_ref[...] + b_ref[...]          # f32 epilogue (safe on v5e too)
            if activation == "gelu":
                # TODO(synk): HF DistilBERT uses erf-based GELU; tanh approximation
                # kept here (erf lowering in-kernel is not guaranteed on Mosaic).
                c = math.sqrt(2.0 / math.pi)
                y = 0.5 * y * (1.0 + jnp.tanh(c * (y + 0.044715 * y * y * y)))
            o_ref[...] = y.astype(o_ref.dtype)

    return pl.pallas_call(
        kernel,
        grid=(gm, gn, gk),
        in_specs=[
            pl.BlockSpec((tm, tk), lambda i, j, k: (i, k)),
            pl.BlockSpec((tk, tn), lambda i, j, k: (k, j)),
            pl.BlockSpec((1, tn), lambda i, j, k: (0, j)),
        ],
        out_specs=pl.BlockSpec((tm, tn), lambda i, j, k: (i, j)),
        out_shape=jax.ShapeDtypeStruct((M, N), out_dtype),
        scratch_shapes=[pltpu.VMEM((tm, tn), jnp.float32)],
        compiler_params=pltpu.CompilerParams(
            dimension_semantics=("parallel", "parallel", "arbitrary"),
            vmem_limit_bytes=_VMEM_LIMIT),
    )(x.astype(jnp.bfloat16), w.astype(jnp.bfloat16), b2)


def pallas_layernorm(x, gamma, beta, residual=None, eps=1e-12,
                     out_dtype=jnp.bfloat16):
    """LayerNorm over the hidden axis, optionally fused with a residual add:
    out = LN(x + residual). Row-tiled; math in f32."""
    M, H = x.shape
    tm = _aligned_tile(M, 512, 8)
    g2 = gamma.reshape(1, H).astype(jnp.float32)
    b2 = beta.reshape(1, H).astype(jnp.float32)
    has_res = residual is not None

    def kernel(*refs):
        if has_res:
            x_ref, r_ref, g_ref, b_ref, o_ref = refs
            xv = x_ref[...].astype(jnp.float32) + r_ref[...].astype(jnp.float32)
        else:
            x_ref, g_ref, b_ref, o_ref = refs
            xv = x_ref[...].astype(jnp.float32)
        mu = jnp.mean(xv, axis=-1, keepdims=True)
        var = jnp.mean((xv - mu) ** 2, axis=-1, keepdims=True)
        inv = jax.lax.rsqrt(var + eps)
        o_ref[...] = (((xv - mu) * inv) * g_ref[...] + b_ref[...]).astype(o_ref.dtype)

    row_spec = pl.BlockSpec((tm, H), lambda i: (i, 0))
    vec_spec = pl.BlockSpec((1, H), lambda i: (0, 0))
    in_specs = [row_spec] + ([row_spec] if has_res else []) + [vec_spec, vec_spec]
    args = [x] + ([residual] if has_res else []) + [g2, b2]

    return pl.pallas_call(
        kernel,
        grid=(M // tm,),
        in_specs=in_specs,
        out_specs=row_spec,
        out_shape=jax.ShapeDtypeStruct((M, H), out_dtype),
        compiler_params=pltpu.CompilerParams(
            dimension_semantics=("parallel",),
            vmem_limit_bytes=_VMEM_LIMIT),
    )(*args)


def pallas_attention(q, k, v, mask, out_dtype=jnp.bfloat16):
    """Masked scaled-dot-product attention, flash-style (online softmax).
    q/k/v: [BH, S, Dh] bf16, mask: [BH, S] (1 = keep).
    Grid = (BH tiles, q tiles, kv tiles); kv axis is the reduction axis."""
    BH, S, Dh = q.shape
    scale = 1.0 / math.sqrt(Dh)

    tb = _any_tile(BH, 8)
    tq = _aligned_tile(S, 256, 8)
    tkv = _aligned_tile(S, 256, 128)   # lane-dense for the mask / scores axis
    gb, gq, gk = BH // tb, S // tq, S // tkv

    mask_f = mask.astype(jnp.float32)

    def kernel(q_ref, k_ref, v_ref, m_ref, o_ref, m_sc, l_sc, acc_sc):
        kv_i = pl.program_id(2)

        @pl.when(kv_i == 0)
        def _init():
            m_sc[...] = jnp.full_like(m_sc, -jnp.inf)
            l_sc[...] = jnp.zeros_like(l_sc)
            acc_sc[...] = jnp.zeros_like(acc_sc)

        s = jnp.einsum("bqd,bkd->bqk", q_ref[...], k_ref[...],
                       preferred_element_type=jnp.float32) * scale   # f32 scores
        msk = m_ref[...][:, None, :]                                  # [tb,1,tkv]
        s = jnp.where(msk > 0.0, s, jnp.float32(-1e9))

        m_new = jnp.maximum(m_sc[...], s.max(-1, keepdims=True))
        alpha = jnp.exp(m_sc[...] - m_new)
        p = jnp.exp(s - m_new)
        l_sc[...] = alpha * l_sc[...] + p.sum(-1, keepdims=True)
        acc_sc[...] = alpha * acc_sc[...] + jnp.einsum(
            "bqk,bkd->bqd", p.astype(v_ref.dtype), v_ref[...],
            preferred_element_type=jnp.float32)
        m_sc[...] = m_new

        @pl.when(kv_i == pl.num_programs(2) - 1)
        def _finalize():
            o_ref[...] = (acc_sc[...] *
                          pl.reciprocal(l_sc[...], approx=True)).astype(o_ref.dtype)

    return pl.pallas_call(
        kernel,
        grid=(gb, gq, gk),
        in_specs=[
            pl.BlockSpec((tb, tq, Dh), lambda b, qi, ki: (b, qi, 0)),
            pl.BlockSpec((tb, tkv, Dh), lambda b, qi, ki: (b, ki, 0)),
            pl.BlockSpec((tb, tkv, Dh), lambda b, qi, ki: (b, ki, 0)),
            pl.BlockSpec((tb, tkv), lambda b, qi, ki: (b, ki)),
        ],
        out_specs=pl.BlockSpec((tb, tq, Dh), lambda b, qi, ki: (b, qi, 0)),
        out_shape=jax.ShapeDtypeStruct((BH, S, Dh), out_dtype),
        scratch_shapes=[pltpu.VMEM((tb, tq, 1), jnp.float32),
                        pltpu.VMEM((tb, tq, 1), jnp.float32),
                        pltpu.VMEM((tb, tq, Dh), jnp.float32)],
        compiler_params=pltpu.CompilerParams(
            dimension_semantics=("parallel", "parallel", "arbitrary"),
            vmem_limit_bytes=_VMEM_LIMIT),
    )(q.astype(jnp.bfloat16), k.astype(jnp.bfloat16),
      v.astype(jnp.bfloat16), mask_f)


# ------------------------- deterministic parameters ------------------------- #

def init_params(key, vocab_size, max_pos, H, n_heads, ffn, n_layers, n_classes):
    keys = jax.random.split(key, 3 + n_layers)

    def dense(k, fan_in, fan_out):
        return jax.random.normal(k, (fan_in, fan_out), jnp.float32) * 0.02

    params = {
        "word_emb": jax.random.normal(keys[0], (vocab_size, H), jnp.float32) * 0.02,
        "pos_emb": jax.random.normal(keys[1], (max_pos, H), jnp.float32) * 0.02,
        "emb_ln_g": jnp.ones((H,), jnp.float32),
        "emb_ln_b": jnp.zeros((H,), jnp.float32),
        "cls_w": dense(keys[2], H, n_classes),
        "cls_b": jnp.zeros((n_classes,), jnp.float32),
        "layers": [],
    }
    for li in range(n_layers):
        lk = jax.random.split(keys[3 + li], 6)
        params["layers"].append({
            "q_w": dense(lk[0], H, H), "q_b": jnp.zeros((H,), jnp.float32),
            "k_w": dense(lk[1], H, H), "k_b": jnp.zeros((H,), jnp.float32),
            "v_w": dense(lk[2], H, H), "v_b": jnp.zeros((H,), jnp.float32),
            "o_w": dense(lk[3], H, H), "o_b": jnp.zeros((H,), jnp.float32),
            "sa_ln_g": jnp.ones((H,), jnp.float32),
            "sa_ln_b": jnp.zeros((H,), jnp.float32),
            "ffn1_w": dense(lk[4], H, ffn), "ffn1_b": jnp.zeros((ffn,), jnp.float32),
            "ffn2_w": dense(lk[5], ffn, H), "ffn2_b": jnp.zeros((H,), jnp.float32),
            "out_ln_g": jnp.ones((H,), jnp.float32),
            "out_ln_b": jnp.zeros((H,), jnp.float32),
        })
    return params


# ---------------------------------- forward --------------------------------- #

def bert_hate_speech_classifier(params, input_ids, attention_mask, n_heads):
    B, S = input_ids.shape
    H = params["word_emb"].shape[1]
    Dh = H // n_heads

    # embeddings (gather is plain-JAX glue) + LayerNorm (Pallas)
    x = params["word_emb"][input_ids] + params["pos_emb"][:S][None, :, :]   # [B,S,H]
    x = x.reshape(B * S, H).astype(jnp.bfloat16)
    x = pallas_layernorm(x, params["emb_ln_g"], params["emb_ln_b"])
    # embedding dropout (p=0.1): identity at inference

    mask_h = jnp.broadcast_to(attention_mask.astype(jnp.float32)[:, None, :],
                              (B, n_heads, S)).reshape(B * n_heads, S)

    # TODO(synk): head split/merge stays as XLA transposes; a BlockSpec column
    # slice of width Dh would violate the (8,128) lane-block constraint.
    def split_heads(t):
        return t.reshape(B, S, n_heads, Dh).transpose(0, 2, 1, 3).reshape(B * n_heads, S, Dh)

    for lp in params["layers"]:
        # fused QKV projection: one [M,H] x [H,3H] matmul
        qkv_w = jnp.concatenate([lp["q_w"], lp["k_w"], lp["v_w"]], axis=1)
        qkv_b = jnp.concatenate([lp["q_b"], lp["k_b"], lp["v_b"]], axis=0)
        qkv = pallas_linear(x, qkv_w, qkv_b)                       # [B*S, 3H] bf16
        q, k, v = jnp.split(qkv, 3, axis=1)

        ctx = pallas_attention(split_heads(q), split_heads(k), split_heads(v), mask_h)
        ctx = ctx.reshape(B, n_heads, S, Dh).transpose(0, 2, 1, 3).reshape(B * S, H)

        attn_out = pallas_linear(ctx, lp["o_w"], lp["o_b"])
        x = pallas_layernorm(attn_out, lp["sa_ln_g"], lp["sa_ln_b"], residual=x)

        h = pallas_linear(x, lp["ffn1_w"], lp["ffn1_b"], activation="gelu")
        h = pallas_linear(h, lp["ffn2_w"], lp["ffn2_b"])
        x = pallas_layernorm(h, lp["out_ln_g"], lp["out_ln_b"], residual=x)

    hidden = x.reshape(B, S, H)
    pooled = hidden[:, 0, :].astype(jnp.float32)      # last_hidden_state[:, 0, :]
    # self.dropout (p=0.3): identity at inference
    # classifier head: N=2 is MXU/lane-degenerate -> plain JAX (negligible FLOPs)
    logits = pooled @ params["cls_w"] + params["cls_b"]
    return logits


if __name__ == "__main__":
    key = jax.random.PRNGKey(0)
    B, S, H, n_heads, ffn_dim, n_layers = 2, 8, 32, 4, 64, 2
    vocab_size, max_pos, n_classes = 50, 16, 2

    pkey, ikey = jax.random.split(key)
    params = init_params(pkey, vocab_size, max_pos, H, n_heads, ffn_dim, n_layers, n_classes)

    input_ids = jax.random.randint(ikey, (B, S), 0, vocab_size, dtype=jnp.int32)
    attention_mask = jnp.array([[1] * S, [1] * (S - 2) + [0] * 2], dtype=jnp.int32)

    logits = bert_hate_speech_classifier(params, input_ids, attention_mask, n_heads)
    jax.block_until_ready(logits)
    assert logits.shape == (B, n_classes)
    print("KERNEL_OK")
</pallas_src>

<mosaic_0001>
module attributes {stable_mosaic.version = 11 : i64} {
  func.func @kernel(%arg0: i32, %arg1: memref<16x32xbf16, #tpu.memory_space<vmem>>, %arg2: memref<1x32xf32, #tpu.memory_space<vmem>>, %arg3: memref<1x32xf32, #tpu.memory_space<vmem>>, %arg4: memref<16x32xbf16, #tpu.memory_space<vmem>>) attributes {dimension_semantics = [#tpu.dimension_semantics<parallel>], iteration_bounds = array<i64: 1>, scalar_prefetch = 0 : i64, scratch_operands = 0 : i64, tpu.core_type = #tpu.core_type<tc>, window_params = [{transform_indices = @transform_0, window_bounds = array<i64: 16, 32>}, {pipeline_mode = #tpu.pipeline_mode<synchronous>, transform_indices = @transform_1, window_bounds = array<i64: 1, 32>}, {pipeline_mode = #tpu.pipeline_mode<synchronous>, transform_indices = @transform_2, window_bounds = array<i64: 1, 32>}, {transform_indices = @transform_3, window_bounds = array<i64: 16, 32>}]} {
    %c0 = arith.constant 0 : index
    %c0_0 = arith.constant 0 : index
    %0 = vector.load %arg1[%c0, %c0_0] : memref<16x32xbf16, #tpu.memory_space<vmem>>, vector<16x32xbf16>
    %1 = arith.extf %0 : vector<16x32xbf16> to vector<16x32xf32>
    %cst = arith.constant dense<0.000000e+00> : vector<16xf32>
    %2 = vector.multi_reduction <add>, %1, %cst [1] : vector<16x32xf32> to vector<16xf32>
    %3 = vector.shape_cast %2 : vector<16xf32> to vector<16x1xf32>
    %cst_1 = arith.constant 3.200000e+01 : f32
    %4 = vector.broadcast %cst_1 : f32 to vector<16x1xf32>
    %5 = arith.divf %3, %4 : vector<16x1xf32>
    %6 = vector.broadcast %5 : vector<16x1xf32> to vector<16x32xf32>
    %7 = arith.subf %1, %6 : vector<16x32xf32>
    %8 = arith.mulf %7, %7 : vector<16x32xf32>
    %cst_2 = arith.constant dense<0.000000e+00> : vector<16xf32>
    %9 = vector.multi_reduction <add>, %8, %cst_2 [1] : vector<16x32xf32> to vector<16xf32>
    %10 = vector.shape_cast %9 : vector<16xf32> to vector<16x1xf32>
    %cst_3 = arith.constant 3.200000e+01 : f32
    %11 = vector.broadcast %cst_3 : f32 to vector<16x1xf32>
    %12 = arith.divf %10, %11 : vector<16x1xf32>
    %cst_4 = arith.constant 9.99999996E-13 : f32
    %13 = vector.broadcast %cst_4 : f32 to vector<16x1xf32>
    %14 = arith.addf %12, %13 : vector<16x1xf32>
    %15 = math.rsqrt %14 : vector<16x1xf32>
    %16 = vector.broadcast %5 : vector<16x1xf32> to vector<16x32xf32>
    %17 = arith.subf %1, %16 : vector<16x32xf32>
    %18 = vector.broadcast %15 : vector<16x1xf32> to vector<16x32xf32>
    %19 = arith.mulf %17, %18 : vector<16x32xf32>
    %c0_5 = arith.constant 0 : index
    %c0_6 = arith.constant 0 : index
    %20 = vector.load %arg2[%c0_5, %c0_6] : memref<1x32xf32, #tpu.memory_space<vmem>>, vector<1x32xf32>
    %21 = vector.broadcast %20 : vector<1x32xf32> to vector<16x32xf32>
    %22 = arith.mulf %19, %21 : vector<16x32xf32>
    %c0_7 = arith.constant 0 : index
    %c0_8 = arith.constant 0 : index
    %23 = vector.load %arg3[%c0_7, %c0_8] : memref<1x32xf32, #tpu.memory_space<vmem>>, vector<1x32xf32>
    %24 = vector.broadcast %23 : vector<1x32xf32> to vector<16x32xf32>
    %25 = arith.addf %22, %24 : vector<16x32xf32>
    %26 = arith.truncf %25 : vector<16x32xf32> to vector<16x32xbf16>
    %c0_9 = arith.constant 0 : index
    %c0_10 = arith.constant 0 : index
    %27 = vector.load %arg4[%c0_9, %c0_10] : memref<16x32xbf16, #tpu.memory_space<vmem>>, vector<16x32xbf16>
    tpu.vector_store %arg4[%c0_9, %c0_10], %26 {strides = array<i32>} : memref<16x32xbf16, #tpu.memory_space<vmem>>, vector<16x32xbf16>,
    return
  }
  func.func @transform_0(%arg0: i32) -> (i32, i32) {
    %c0_i32 = arith.constant 0 : i32
    %c0_i32_0 = arith.constant 0 : i32
    return %arg0, %c0_i32 : i32, i32
  }
  func.func @transform_1(%arg0: i32) -> (i32, i32) {
    %c0_i32 = arith.constant 0 : i32
    %c0_i32_0 = arith.constant 0 : i32
    %c0_i32_1 = arith.constant 0 : i32
    return %c0_i32, %c0_i32_0 : i32, i32
  }
  func.func @transform_2(%arg0: i32) -> (i32, i32) {
    %c0_i32 = arith.constant 0 : i32
    %c0_i32_0 = arith.constant 0 : i32
    %c0_i32_1 = arith.constant 0 : i32
    return %c0_i32, %c0_i32_0 : i32, i32
  }
  func.func @transform_3(%arg0: i32) -> (i32, i32) {
    %c0_i32 = arith.constant 0 : i32
    %c0_i32_0 = arith.constant 0 : i32
    return %arg0, %c0_i32 : i32, i32
  }
}

</mosaic_0001>

<bundles_post_ra>
// kernel: tpu_custom_call.1
= control target key start
LH: loop header
LB: loop body
LE: loop exit
PB: predicated region body
PF: predicated region fallthrough
CT: control target
= control target key end

     0   :  { %8 = vsyncpa [#allocation3], 0  ;;  %s237_s0 = inlined_call_operand.hbm [shape: bf16[16,32], index: 0, kind: input, shape index: {}]   ;;  %s238_s1 = inlined_call_operand.vmem [shape: f32[1,32], index: 1, kind: input, shape index: {}]   ;;  %s239_s2 = inlined_call_operand.vmem [shape: f32[1,32], index: 2, kind: input, shape index: {}]   ;;  %s240_s3 = inlined_call_operand.hbm [shape: bf16[16,32], index: 3, kind: output, shape index: {}]  }
   0x1   :  { %9 = vsyncpa [#allocation4], 0  ;;  %s173_s12 = smov [#allocation2]   ;;  %s125_s16 = scalar_lea.hbm %s237_s0, 128 }
   0x2   :  { %s15_s13 = sshll.u32 %s173_s12, 4  ;;  %p126_p0 = scmp.ne.s32.totalorder %s237_s0, %s125_s16  ;;  %s16_s13 = int_to_ptr.vmem [resolvable:$true] %s15_s13 }
   0x3   :  { %p129_p1 = scmp.lt.u32.totalorder %s125_s16, %s237_s0 }
   0x5   :  { %p131_p2 = pnand %p129_p1, %p126_p0 }
   0x7   :  { %134 = shalt.err (!%p131_p2)
}
   0x8   :  { %s135_s21 = scalar_lea.vmem %s16_s13, 128  ;;  %p140_p4 = scmp.lt.s32.totalorder %s16_s13, %s16_s13 }
   0x9   :  { %p136_p3 = scmp.ne.s32.totalorder %s16_s13, %s135_s21  ;;  %p141_p5 = scmp.lt.s32.totalorder %s135_s21, %s135_s21 }
   0xb   :  { %p142_p6 = por %p141_p5, %p140_p4 }
   0xd   :  { %p143_p7 = pnand %p142_p6, %p136_p3 }
   0xf   :  { %146 = shalt.err (!%p143_p7)
}
  0x10   :  { %s174_s22 = smov 64   ;;  %s175_s23 = smov 4  }
  0x11   :  { %21 = dma.hbm_to_vmem [thread:$0]  %s237_s0, 128, %s16_s13, [#allocation3], %s174_s22, %s174_s22, %s175_s23  }
  0x12   :  { %169 = dma.done.wait [#allocation3], 128  }
  0x13   :  { %170 = vsyncadd [#allocation3], 4294967168  ;;  %v114_v0 = vld [vmem:[#allocation2] sm:$0xff]   ;;  %vm33_vm0 = vcmask 261120   ;;  %vm87_vm1 = vcmask 257024   ;;  %s176_s29 = smov [#allocation5]  }
  0x14   :  { %v115_v1 = vunpack.c.l.bf16 %v114_v0  ;;  %v116_v2 = vunpack.c.h.bf16 %v114_v0  ;;  %v107_v22 = vld [vmem:[%s238_s1] ss:$0 sm:$0xff]  ;;  %s95_s30 = sshll.u32 %s176_s29, 4  ;;  %s96_s30 = int_to_ptr.vmem [resolvable:$true] %s95_s30 }
  0x15   :  { %v108_v24 = vld [vmem:[%s239_s2] ss:$0 sm:$0xff]  ;;  %s147_s1 = scalar_lea.vmem %s96_s30, 128  ;;  %p152_p9 = scmp.lt.s32.totalorder %s96_s30, %s96_s30 }
  0x16   :  { %v34_v3 = vsel %vm33_vm0, %v115_v1, 0.0  ;;  %v37_v4 = vsel %vm33_vm0, %v116_v2, 0.0  ;;  %p148_p8 = scmp.ne.s32.totalorder %s96_s30, %s147_s1  ;;  %p153_p10 = scmp.lt.s32.totalorder %s147_s1, %s147_s1 }
  0x17   :  { %35 = vadd.xlane.f32.xlu0 %v34_v3 }
  0x18   :  { %p154_p11 = por %p153_p10, %p152_p9 }
  0x1a   :  { %p155_p12 = pnand %p154_p11, %p148_p8 }
  0x1b   :  { %38 = vadd.xlane.f32.xlu0 %v37_v4 }
  0xa4   :  { %v36_v5 = vpop.xlane.xlu0 %35 }
  0xa5   :  { %v41_v6 = vmul.f32 0.03125, %v36_v5 }
  0xa7   :  { %v43_v7 = vsub.f32 %v115_v1, %v41_v6 }
  0xa8   :  { %v39_v8 = vpop.xlane.xlu0 %38 }
  0xa9   :  { %v42_v9 = vmul.f32 0.03125, %v39_v8  ;;  %v45_v10 = vmul.f32 %v43_v7, %v43_v7 }
  0xab   :  { %v44_v11 = vsub.f32 %v116_v2, %v42_v9  ;;  %v47_v12 = vsel %vm33_vm0, %v45_v10, 0.0 }
  0xac   :  { %48 = vadd.xlane.f32.xlu1 %v47_v12 }
  0xad   :  { %v46_v13 = vmul.f32 %v44_v11, %v44_v11 }
  0xaf   :  { %v50_v14 = vsel %vm33_vm0, %v46_v13, 0.0 }
  0xb0   :  { %51 = vadd.xlane.f32.xlu1 %v50_v14 }
 0x139   :  { %v49_v15 = vpop.xlane.xlu1 %48 }
 0x13a   :  { %v53_v16 = vmul.f32 0.03125, %v49_v15 }
 0x13c   :  { %v55_v17 = vadd.f32 1e-12, %v53_v16 }
 0x13d   :  { %v52_v18 = vpop.xlane.xlu1 %51 }
 0x13e   :  { %121 = vrsqrt.f32 %v55_v17  ;;  %v54_v19 = vmul.f32 0.03125, %v52_v18 }
 0x140   :  { %v56_v20 = vadd.f32 1e-12, %v54_v19 }
 0x142   :  { %123 = vrsqrt.f32 %v56_v20 }
 0x148   :  { %v122_v21 = vpop.eup %121 }
 0x149   :  { %v59_v23 = vmul.f32 %v122_v21, %v43_v7 }
 0x14b   :  { %v68_v25 = vmul.f32 %v107_v22, %v59_v23 }
 0x14c   :  { %v124_v26 = vpop.eup %123 }
 0x14d   :  { %v60_v27 = vmul.f32 %v124_v26, %v44_v11  ;;  %v77_v28 = vadd.f32 %v108_v24, %v68_v25 }
 0x14f   :  { %v69_v29 = vmul.f32 %v107_v22, %v60_v27  ;;  %v111_v30 = vpack.c.bf16 %v77_v28, %v77_v28 }
 0x151   :  { %v78_v31 = vadd.f32 %v108_v24, %v69_v29  ;;  %88 = vst.msk [vmem:[#allocation5] sm:$0xf] %vm87_vm1, %v111_v30 }
 0x153   :  { %v112_v32 = vpack.c.bf16 %v78_v31, %v78_v31 }
 0x155   :  { %89 = vst.msk [vmem:[#allocation5 + $0x4] sm:$0xf] %vm87_vm1, %v112_v32 }
 0x156   :  { %158 = shalt.err (!%p155_p12)
}
 0x157   :  { %s159_s5 = scalar_lea.hbm %s240_s3, 128 }
 0x158   :  { %p160_p13 = scmp.ne.s32.totalorder %s240_s3, %s159_s5  ;;  %p163_p0 = scmp.lt.u32.totalorder %s159_s5, %s240_s3 }
 0x15a   :  { %p165_p1 = pnand %p163_p0, %p160_p13 }
 0x15c   :  { %168 = shalt.err (!%p165_p1)
}
 0x15d   :  { %101 = dma.vmem_to_hbm [thread:$0]  %s96_s30, 128, %s240_s3, [#allocation4], %s174_s22, %s174_s22, %s175_s23  }
 0x15e   :  { %171 = dma.done.wait [#allocation4], 128  }
 0x15f   :  { %172 = vsyncadd [#allocation4], 4294967168 }
 0x160   :  { %105 = vsyncpa [#allocation3], 1 }
 0x161   :  { %106 = vsyncpa [#allocation4], 1 }

</bundles_post_ra>
